<compile_context>
chip_gen: v6e
topology: v6e:2x2x1
jax: 0.10.0
libtpu: 0.0.40
codegen_flags: <defaults>
</compile_context>

<pallas_src>
import functools

import jax
import jax.numpy as jnp
from jax.experimental import pallas as pl
from jax.experimental.pallas import tpu as pltpu


def _gce_kernel(logits_ref, targets_ref, loss_ref, *, q):
    # logits_ref : (tile_n, C)   input dtype (f32 or bf16)
    # targets_ref: (tile_n, 1)   int32
    # loss_ref   : (1, tile_n // 128, 128) float32   (lane-dense)
    x = logits_ref[...]                                              # (tn, C)
    tgt = targets_ref[...]                                           # (tn, 1)

    # Per-row reductions along the class (lane) axis.  max / select are exact in
    # the input dtype; only the exp-sum is run in f32.
    row_max = jnp.max(x, axis=-1, keepdims=True)                     # (tn, 1)
    class_ids = jax.lax.broadcasted_iota(jnp.int32, x.shape, 1)      # (tn, C)
    tgt_logit = jnp.sum(jnp.where(class_ids == tgt, x, 0.0),
                        axis=-1, keepdims=True)                      # (tn, 1)

    shifted = x - row_max                                            # input dtype
    sumexp = jnp.sum(jnp.exp(shifted.astype(jnp.float32)),
                     axis=-1, keepdims=True)                         # (tn, 1) f32
    log_p_t = (tgt_logit.astype(jnp.float32)
               - row_max.astype(jnp.float32)) - jnp.log(sumexp)      # (tn, 1)

    # weight = p_t**q * q == exp(q * log_p_t) * q   (single EUP exp, no pow/log)
    loss_col = (-log_p_t) * (jnp.exp(q * log_p_t) * q)               # (tn, 1) f32

    # Relayout the per-row column into lane-dense rows of 128:
    #   out[g, j] = loss_col[g*128 + j]
    # Implemented as a select against a 128x128 "eye" mask followed by a
    # cross-sublane sum -- pure VPU/XLU work, every op natively supported, and
    # garbage from out-of-bounds tail rows cannot leak across rows (select, not
    # multiply).
    eye = (jax.lax.broadcasted_iota(jnp.int32, (128, 128), 0) ==
           jax.lax.broadcasted_iota(jnp.int32, (128, 128), 1))
    n_groups = loss_ref.shape[1]
    for g in range(n_groups):                                        # static unroll
        col_g = loss_col[g * 128:(g + 1) * 128, :]                   # (128, 1)
        dense = jnp.sum(jnp.where(eye, col_g, 0.0),
                        axis=0, keepdims=True)                       # (1, 128)
        loss_ref[0, g:g + 1, :] = dense


def _vmem_limit_bytes():
    try:
        cap = int(pltpu.get_tpu_info().vmem_capacity_bytes)
    except Exception:
        cap = 64 << 20                      # conservative: v7x per-TensorCore VMEM
    return min(96 << 20, (cap * 3) // 4)    # 96 MiB on v5e/v6e, 48 MiB on v7x


def _num_tensorcores():
    # Only used to decide whether manufacturing extra grid steps is worthwhile
    # (megacore sharding).  Defaults to 1 if the attribute is not exposed.
    try:
        return max(1, int(getattr(jax.devices()[0], "num_cores", 1)))
    except Exception:
        return 1


def _pick_tile_n(n_rows, n_classes, itemsize, vmem_limit, num_cores):
    # VMEM tiles are lane-padded: a (tile_n, C) block occupies ceil(C/128)*128
    # lanes per row regardless of C, so size with the padded width.
    c_pad = ((n_classes + 127) // 128) * 128
    # Double-buffered input block + ~3 f32-wide intermediates per padded element
    # (shifted / exp / iota-mask), plus the tiny targets/output columns.
    per_row = c_pad * (2 * itemsize + 3 * 4) + 32
    tile_n = (vmem_limit // 2) // max(per_row, 1)        # 2x headroom
    # 8192 only bounds the relayout unroll / compile time; VMEM is the real cap.
    tile_n = min(tile_n, 8192, max(128, (n_rows // 128) * 128))
    tile_n = max(128, (tile_n // 128) * 128)
    # Only manufacture extra grid steps on multi-TensorCore chips (v7x), and
    # never shrink per-step HBM traffic below ~512 KiB (per-step overhead).
    if num_cores > 1:
        min_step_bytes = 512 << 10
        while (tile_n > 128 and pl.cdiv(n_rows, tile_n) < 2 * num_cores
               and (tile_n // 2) * n_classes * itemsize >= min_step_bytes):
            tile_n = max(128, ((tile_n // 2) // 128) * 128)
    return tile_n


def generalized_ce_loss(logits, targets, q=0.7, tile_n=None):
    """logits: (N, C) float32/bfloat16, targets: (N,) int -> (N,) float32 loss.

    Forward-only semantics of GeneralizedCELoss (the weight Yg**q * q is treated
    as detached).  `q` must be a static Python float.
    """
    N, C = logits.shape
    itemsize = jnp.dtype(logits.dtype).itemsize
    vmem_limit = _vmem_limit_bytes()

    # Pad only truly tiny batches to one full 128-row group (trivial cost);
    # larger ragged N is handled by a non-divisible last block (no HBM copy).
    n_rows = N
    if N < 128:
        logits = jnp.pad(logits, ((0, 128 - N), (0, 0)))
        targets = jnp.pad(targets, ((0, 128 - N),))
        n_rows = 128

    if tile_n is None:
        tile_n = _pick_tile_n(n_rows, C, itemsize, vmem_limit, _num_tensorcores())
    tile_n = max(128, min((int(tile_n) // 128) * 128, (n_rows // 128) * 128))

    num_tiles = pl.cdiv(n_rows, tile_n)
    g128 = tile_n // 128
    targets2d = targets.astype(jnp.int32).reshape(n_rows, 1)

    cost = pl.CostEstimate(
        flops=6 * N * C,
        transcendentals=N * C + 3 * N,
        bytes_accessed=N * C * itemsize + N * 4 + num_tiles * tile_n * 4,
    )

    kernel = functools.partial(_gce_kernel, q=q)
    out = pl.pallas_call(
        kernel,
        out_shape=jax.ShapeDtypeStruct((num_tiles, g128, 128), jnp.float32),
        grid_spec=pltpu.PrefetchScalarGridSpec(
            num_scalar_prefetch=0,
            grid=(num_tiles,),
            in_specs=[
                pl.BlockSpec((tile_n, C), lambda i: (i, 0)),
                pl.BlockSpec((tile_n, 1), lambda i: (i, 0)),
            ],
            out_specs=pl.BlockSpec((1, g128, 128), lambda i: (i, 0, 0)),
        ),
        compiler_params=pltpu.CompilerParams(
            dimension_semantics=("parallel",),
            vmem_limit_bytes=vmem_limit,
        ),
        cost_estimate=cost,
    )(logits, targets2d)

    flat = out.reshape(num_tiles * tile_n)
    return flat if flat.shape[0] == N else flat[:N]


def _reference_gce(logits, targets, q=0.7):
    logp = jax.nn.log_softmax(logits.astype(jnp.float32), axis=1)
    log_p_t = jnp.take_along_axis(logp, targets[:, None].astype(jnp.int32),
                                  axis=1)[:, 0]
    p_t = jnp.exp(log_p_t)
    return (-log_p_t) * (p_t ** q) * q


if __name__ == "__main__":
    key = jax.random.PRNGKey(0)

    # 1) original toy shape (f32)
    k1, k2 = jax.random.split(key)
    N, C = 16, 10
    logits = jax.random.normal(k1, (N, C), dtype=jnp.float32)
    targets = jax.random.randint(k2, (N,), 0, C, dtype=jnp.int32)
    loss = jax.block_until_ready(generalized_ce_loss(logits, targets, q=0.7))
    ref = _reference_gce(logits, targets, q=0.7)
    assert loss.shape == (N,)
    assert jnp.allclose(loss, ref, atol=1e-5, rtol=1e-5), (loss, ref)

    # 2) ragged batch size (exercises tiny-N pad + slice path)
    k3, k4 = jax.random.split(k1)
    N2, C2 = 13, 7
    logits2 = jax.random.normal(k3, (N2, C2), dtype=jnp.float32)
    targets2 = jax.random.randint(k4, (N2,), 0, C2, dtype=jnp.int32)
    loss2 = jax.block_until_ready(generalized_ce_loss(logits2, targets2, q=0.7))
    ref2 = _reference_gce(logits2, targets2, q=0.7)
    assert loss2.shape == (N2,)
    assert jnp.allclose(loss2, ref2, atol=1e-5, rtol=1e-5), (loss2, ref2)

    # 3) bfloat16 logits (max/gather stay in bf16, exp-sum in f32; the bf16
    #    shift rounding bounds the error, so compare with a looser tolerance)
    k5, k6 = jax.random.split(k3)
    N3, C3 = 64, 32
    logits3 = jax.random.normal(k5, (N3, C3), dtype=jnp.float32).astype(jnp.bfloat16)
    targets3 = jax.random.randint(k6, (N3,), 0, C3, dtype=jnp.int32)
    loss3 = jax.block_until_ready(generalized_ce_loss(logits3, targets3, q=0.7))
    ref3 = _reference_gce(logits3.astype(jnp.float32), targets3, q=0.7)
    assert loss3.shape == (N3,)
    assert jnp.allclose(loss3, ref3, atol=1e-2, rtol=2e-2), (loss3, ref3)

    # 4) multi-tile grid + multi-group lane-dense relayout + non-divisible
    #    last input block (N=1000 is not a multiple of the 896-row tile)
    k7, k8 = jax.random.split(k5)
    N4, C4 = 1000, 37
    logits4 = jax.random.normal(k7, (N4, C4), dtype=jnp.float32)
    targets4 = jax.random.randint(k8, (N4,), 0, C4, dtype=jnp.int32)
    loss4 = jax.block_until_ready(generalized_ce_loss(logits4, targets4, q=0.7))
    ref4 = _reference_gce(logits4, targets4, q=0.7)
    assert loss4.shape == (N4,)
    assert jnp.allclose(loss4, ref4, atol=1e-5, rtol=1e-5), (loss4, ref4)

    print("KERNEL_OK")
</pallas_src>

<mosaic_0001>
module attributes {stable_mosaic.version = 11 : i64} {
  func.func @_gce_kernel(%arg0: i32, %arg1: memref<128x10xf32, #tpu.memory_space<vmem>>, %arg2: memref<128x1xi32, #tpu.memory_space<vmem>>, %arg3: memref<1x1x128xf32, #tpu.memory_space<vmem>>) attributes {dimension_semantics = [#tpu.dimension_semantics<parallel>], iteration_bounds = array<i64: 1>, scalar_prefetch = 0 : i64, scratch_operands = 0 : i64, tpu.core_type = #tpu.core_type<tc>, window_params = [{transform_indices = @transform_0, window_bounds = array<i64: 128, 10>}, {transform_indices = @transform_1, window_bounds = array<i64: 128, 1>}, {transform_indices = @transform_2, window_bounds = array<i64: 1, 1, 128>}]} {
    %c0 = arith.constant 0 : index
    %c0_0 = arith.constant 0 : index
    %0 = vector.load %arg1[%c0, %c0_0] : memref<128x10xf32, #tpu.memory_space<vmem>>, vector<128x10xf32>
    %c0_1 = arith.constant 0 : index
    %c0_2 = arith.constant 0 : index
    %1 = vector.load %arg2[%c0_1, %c0_2] : memref<128x1xi32, #tpu.memory_space<vmem>>, vector<128x1xi32>
    %cst = arith.constant dense<0xFF800000> : vector<128xf32>
    %2 = vector.multi_reduction <maximumf>, %0, %cst [1] : vector<128x10xf32> to vector<128xf32>
    %3 = vector.shape_cast %2 : vector<128xf32> to vector<128x1xf32>
    %4 = tpu.iota {dimensions = array<i32: 1>} : vector<128x10xi32>
    %5 = vector.broadcast %1 : vector<128x1xi32> to vector<128x10xi32>
    %6 = arith.cmpi eq, %4, %5 : vector<128x10xi32>
    %cst_3 = arith.constant 0.000000e+00 : f32
    %7 = vector.broadcast %cst_3 : f32 to vector<128x10xf32>
    %8 = arith.select %6, %0, %7 : vector<128x10xi1>, vector<128x10xf32>
    %cst_4 = arith.constant dense<0.000000e+00> : vector<128xf32>
    %9 = vector.multi_reduction <add>, %8, %cst_4 [1] : vector<128x10xf32> to vector<128xf32>
    %10 = vector.shape_cast %9 : vector<128xf32> to vector<128x1xf32>
    %11 = vector.broadcast %3 : vector<128x1xf32> to vector<128x10xf32>
    %12 = arith.subf %0, %11 : vector<128x10xf32>
    %13 = math.exp %12 : vector<128x10xf32>
    %cst_5 = arith.constant dense<0.000000e+00> : vector<128xf32>
    %14 = vector.multi_reduction <add>, %13, %cst_5 [1] : vector<128x10xf32> to vector<128xf32>
    %15 = vector.shape_cast %14 : vector<128xf32> to vector<128x1xf32>
    %16 = arith.subf %10, %3 : vector<128x1xf32>
    %17 = math.log %15 : vector<128x1xf32>
    %18 = arith.subf %16, %17 : vector<128x1xf32>
    %cst_6 = arith.constant 0.000000e+00 : f32
    %19 = vector.broadcast %cst_6 : f32 to vector<128x1xf32>
    %20 = arith.subf %19, %18 : vector<128x1xf32>
    %cst_7 = arith.constant 0.699999988 : f32
    %21 = vector.broadcast %cst_7 : f32 to vector<128x1xf32>
    %22 = arith.mulf %21, %18 : vector<128x1xf32>
    %23 = math.exp %22 : vector<128x1xf32>
    %cst_8 = arith.constant 0.699999988 : f32
    %24 = vector.broadcast %cst_8 : f32 to vector<128x1xf32>
    %25 = arith.mulf %23, %24 : vector<128x1xf32>
    %26 = arith.mulf %20, %25 : vector<128x1xf32>
    %27 = tpu.iota {dimensions = array<i32: 0>} : vector<128x128xi32>
    %28 = tpu.iota {dimensions = array<i32: 1>} : vector<128x128xi32>
    %29 = arith.cmpi eq, %27, %28 : vector<128x128xi32>
    %cst_9 = arith.constant 0.000000e+00 : f32
    %30 = vector.shape_cast %26 : vector<128x1xf32> to vector<128x1xf32>
    %31 = vector.broadcast %30 : vector<128x1xf32> to vector<128x128xf32>
    %32 = vector.broadcast %cst_9 : f32 to vector<128x128xf32>
    %33 = arith.select %29, %31, %32 : vector<128x128xi1>, vector<128x128xf32>
    %cst_10 = arith.constant dense<0.000000e+00> : vector<128xf32>
    %34 = vector.multi_reduction <add>, %33, %cst_10 [0] : vector<128x128xf32> to vector<128xf32>
    %35 = vector.shape_cast %34 : vector<128xf32> to vector<1x128xf32>
    %c0_11 = arith.constant 0 : index
    %c0_12 = arith.constant 0 : index
    %c0_13 = arith.constant 0 : index
    %36 = vector.load %arg3[%c0_11, %c0_12, %c0_13] : memref<1x1x128xf32, #tpu.memory_space<vmem>>, vector<1x1x128xf32>
    %37 = vector.shape_cast %36 : vector<1x1x128xf32> to vector<1x128xf32>
    %38 = vector.shape_cast %35 : vector<1x128xf32> to vector<1x1x128xf32>
    tpu.vector_store %arg3[%c0_11, %c0_12, %c0_13], %38 {strides = array<i32>} : memref<1x1x128xf32, #tpu.memory_space<vmem>>, vector<1x1x128xf32>,
    return
  }
  func.func @transform_0(%arg0: i32) -> (i32, i32) {
    %c0_i32 = arith.constant 0 : i32
    %c0_i32_0 = arith.constant 0 : i32
    return %arg0, %c0_i32 : i32, i32
  }
  func.func @transform_1(%arg0: i32) -> (i32, i32) {
    %c0_i32 = arith.constant 0 : i32
    %c0_i32_0 = arith.constant 0 : i32
    return %arg0, %c0_i32 : i32, i32
  }
  func.func @transform_2(%arg0: i32) -> (i32, i32, i32) {
    %c0_i32 = arith.constant 0 : i32
    %c0_i32_0 = arith.constant 0 : i32
    %c0_i32_1 = arith.constant 0 : i32
    return %arg0, %c0_i32, %c0_i32_0 : i32, i32, i32
  }
}

</mosaic_0001>

<bundles_post_ra>
// kernel: tpu_custom_call.1
= control target key start
LH: loop header
LB: loop body
LE: loop exit
PB: predicated region body
PF: predicated region fallthrough
CT: control target
= control target key end

     0   :  { %vm44_vm0 = vcmask 80896   ;;  %v686_v6 = vmov 0   ;;  %s1123_s0 = inlined_call_operand.vmem [shape: f32[128,10], index: 0, kind: input, shape index: {}]   ;;  %s1124_s1 = inlined_call_operand.vmem [shape: s32[128,1], index: 1, kind: input, shape index: {}]   ;;  %s1125_s2 = inlined_call_operand.hbm [shape: f32[1,1,128], index: 2, kind: output, shape index: {}]  }
   0x1   :  { %v706_v0 = vld [vmem:[%s1123_s0 + $0x10] sm:$0xff]  ;;  %v711_v1 = vld [vmem:[%s1123_s0] sm:$0xff]  ;;  %v716_v2 = vld [vmem:[%s1123_s0 + $0x18] sm:$0xff]  ;;  %567 = vset.pattern.permute.xlu1 %v686_v6  ;;  %566 = vset.pattern.permute.xlu0 %v686_v6 }
   0x2   :  { %v51_v3 = vsel %vm44_vm0, %v706_v0, -inf  ;;  %v45_v4 = vsel %vm44_vm0, %v711_v1, -inf  ;;  %v725_v5 = vld [vmem:[%s1123_s0 + $0x8] sm:$0xff]  ;;  %v54_v7 = vsel %vm44_vm0, %v716_v2, -inf  ;;  %v739_v10 = vld [vmem:[%s1123_s0 + $0x20] sm:$0xff]  ;;  %v748_v13 = vld [vmem:[%s1123_s0 + $0x38] sm:$0xff] }
   0x3   :  { %52 = vmax.xlane.f32.xlu1 %v51_v3  ;;  %46 = vmax.xlane.f32.xlu0 %v45_v4  ;;  %v48_v8 = vsel %vm44_vm0, %v725_v5, -inf  ;;  %v734_v9 = vld [vmem:[%s1123_s0 + $0x28] sm:$0xff]  ;;  %v57_v12 = vsel %vm44_vm0, %v739_v10, -inf  ;;  %v753_v14 = vld [vmem:[%s1123_s0 + $0x30] sm:$0xff] }
   0x4   :  { %v60_v11 = vsel %vm44_vm0, %v734_v9, -inf }
   0x7   :  { %55 = vmax.xlane.f32.xlu1 %v54_v7  ;;  %49 = vmax.xlane.f32.xlu0 %v48_v8 }
   0xb   :  { %61 = vmax.xlane.f32.xlu1 %v60_v11  ;;  %58 = vmax.xlane.f32.xlu0 %v57_v12 }
   0xc   :  { %7 = vsyncpa [#allocation3], 0  ;;  %v66_v15 = vsel %vm44_vm0, %v748_v13, -inf  ;;  %v63_v16 = vsel %vm44_vm0, %v753_v14, -inf  ;;  %v762_v17 = vld [vmem:[%s1123_s0 + $0x48] sm:$0xff]  ;;  %v767_v18 = vld [vmem:[%s1123_s0 + $0x40] sm:$0xff]  ;;  %v93_v4 = vlaneseq }
   0xd   :  { %v72_v19 = vsel %vm44_vm0, %v762_v17, -inf  ;;  %v69_v20 = vsel %vm44_vm0, %v767_v18, -inf  ;;  %v776_v21 = vld [vmem:[%s1123_s0 + $0x58] sm:$0xff]  ;;  %v781_v22 = vld [vmem:[%s1123_s0 + $0x50] sm:$0xff]  ;;  %v790_v25 = vld [vmem:[%s1123_s0 + $0x68] sm:$0xff] }
   0xe   :  { %v78_v23 = vsel %vm44_vm0, %v776_v21, -inf  ;;  %v75_v24 = vsel %vm44_vm0, %v781_v22, -inf  ;;  %v795_v26 = vld [vmem:[%s1123_s0 + $0x60] sm:$0xff]  ;;  %v84_v27 = vsel %vm44_vm0, %v790_v25, -inf  ;;  %v804_v29 = vld [vmem:[%s1123_s0 + $0x78] sm:$0xff]  ;;  %v809_v30 = vld [vmem:[%s1123_s0 + $0x70] sm:$0xff] }
   0xf   :  { %67 = vmax.xlane.f32.xlu1 %v66_v15  ;;  %64 = vmax.xlane.f32.xlu0 %v63_v16  ;;  %v81_v28 = vsel %vm44_vm0, %v795_v26, -inf  ;;  %v90_v31 = vsel %vm44_vm0, %v804_v29, -inf  ;;  %v87_v32 = vsel %vm44_vm0, %v809_v30, -inf  ;;  %v29_v33 = vld [vmem:[%s1124_s1 + $0x8] sm:$0xff]  ;;  %v30_v34 = vld [vmem:[%s1124_s1 + $0x10] sm:$0xff]  ;;  %v28_v35 = vld [vmem:[%s1124_s1] sm:$0xff] }
  0x10   :  { %v31_v36 = vld [vmem:[%s1124_s1 + $0x18] sm:$0xff]  ;;  %v37_v37 = vld [vmem:[%s1124_s1 + $0x48] sm:$0xff]  ;;  %v32_v38 = vld [vmem:[%s1124_s1 + $0x20] sm:$0xff]  ;;  %v904_v16 = vand.u32 127, %v93_v4 }
  0x11   :  { %v39_v39 = vld [vmem:[%s1124_s1 + $0x58] sm:$0xff]  ;;  %v33_v40 = vld [vmem:[%s1124_s1 + $0x28] sm:$0xff]  ;;  %v34_v42 = vld [vmem:[%s1124_s1 + $0x30] sm:$0xff] }
  0x12   :  { %v41_v41 = vld [vmem:[%s1124_s1 + $0x68] sm:$0xff]  ;;  %v43_v43 = vld [vmem:[%s1124_s1 + $0x78] sm:$0xff]  ;;  %v36_v45 = vld [vmem:[%s1124_s1 + $0x40] sm:$0xff] }
  0x13   :  { %73 = vmax.xlane.f32.xlu1 %v72_v19  ;;  %70 = vmax.xlane.f32.xlu0 %v69_v20  ;;  %v35_v44 = vld [vmem:[%s1124_s1 + $0x38] sm:$0xff]  ;;  %v38_v46 = vld [vmem:[%s1124_s1 + $0x50] sm:$0xff]  ;;  %v40_v47 = vld [vmem:[%s1124_s1 + $0x60] sm:$0xff] }
  0x14   :  { %v42_v48 = vld [vmem:[%s1124_s1 + $0x70] sm:$0xff]  ;;  %s687_s1 = smov [#allocation2]  }
  0x15   :  { %s556_s16 = sshll.u32 %s687_s1, 4  ;;  %s557_s16 = int_to_ptr.vmem [resolvable:$true] %s556_s16 }
  0x16   :  { %s664_s0 = scalar_lea.vmem %s557_s16, 16  ;;  %s668_s17 = scalar_lea.vmem %s557_s16, 32 }
  0x17   :  { %79 = vmax.xlane.f32.xlu1 %v78_v23  ;;  %76 = vmax.xlane.f32.xlu0 %v75_v24  ;;  %p665_p0 = scmp.ne.s32.totalorder %s557_s16, %s664_s0  ;;  %p669_p1 = scmp.lt.s32.totalorder %s557_s16, %s557_s16 }
  0x18   :  { %p670_p2 = scmp.lt.s32.totalorder %s668_s17, %s664_s0 }
  0x1a   :  { %p671_p3 = por %p670_p2, %p669_p1 }
  0x1b   :  { %85 = vmax.xlane.f32.xlu1 %v84_v27  ;;  %82 = vmax.xlane.f32.xlu0 %v81_v28 }
  0x1c   :  { %p672_p4 = pnand %p671_p3, %p665_p0 }
  0x1f   :  { %91 = vmax.xlane.f32.xlu1 %v90_v31  ;;  %88 = vmax.xlane.f32.xlu0 %v87_v32 }
  0x30   :  { %99 = vperm.xlu1 %567, %v29_v33  }
  0x34   :  { %102 = vperm.xlu1 %567, %v30_v34  }
  0x35   :  { %96 = vperm.xlu0 %566, %v28_v35  }
  0x38   :  { %105 = vperm.xlu1 %567, %v31_v36  }
  0x39   :  { %123 = vperm.xlu0 %566, %v37_v37  }
  0x3c   :  { %108 = vperm.xlu1 %567, %v32_v38  }
  0x3d   :  { %129 = vperm.xlu0 %566, %v39_v39  }
  0x40   :  { %111 = vperm.xlu1 %567, %v33_v40  }
  0x41   :  { %135 = vperm.xlu0 %566, %v41_v41  }
  0x44   :  { %114 = vperm.xlu1 %567, %v34_v42  }
  0x45   :  { %141 = vperm.xlu0 %566, %v43_v43  }
  0x48   :  { %117 = vperm.xlu1 %567, %v35_v44  }
  0x4c   :  { %120 = vperm.xlu1 %567, %v36_v45  }
  0x50   :  { %126 = vperm.xlu1 %567, %v38_v46  }
  0x54   :  { %132 = vperm.xlu1 %567, %v40_v47  }
  0x58   :  { %138 = vperm.xlu1 %567, %v42_v48  }
  0x8c   :  { %v863_v49 = vpop.xlane.xlu1 %52  ;;  %v865_v50 = vpop.xlane.xlu0 %46 }
  0x8d   :  { %v225_v62 = vsub.f32 %v706_v0, %v863_v49  ;;  %v223_v7 = vsub.f32 %v711_v1, %v865_v50 }
  0x8f   :  { %v243_v6 = vmul.f32 1.442695, %v225_v62  ;;  %v239_v19 = vmul.f32 1.442695, %v223_v7 }
  0x90   :  { %v867_v51 = vpop.xlane.xlu1 %55  ;;  %v869_v52 = vpop.xlane.xlu0 %49 }
  0x91   :  { %v224_v59 = vsub.f32 %v725_v5, %v869_v52  ;;  %v226_v15 = vsub.f32 %v716_v2, %v867_v51 }
  0x93   :  { %v241_v63 = vmul.f32 1.442695, %v224_v59  ;;  %v245_v28 = vmul.f32 1.442695, %v226_v15 }
  0x94   :  { %v871_v53 = vpop.xlane.xlu1 %61  ;;  %v873_v54 = vpop.xlane.xlu0 %58 }
  0x95   :  { %568 = vpow2.f32 %v241_v63  ;;  %v227_v11 = vsub.f32 %v739_v10, %v873_v54  ;;  %v228_v31 = vsub.f32 %v734_v9, %v871_v53 }
  0x96   :  { %570 = vpow2.f32 %v243_v6 }
  0x97   :  { %v247_v20 = vmul.f32 1.442695, %v227_v11  ;;  %572 = vpow2.f32 %v239_v19  ;;  %v249_v38 = vmul.f32 1.442695, %v228_v31 }
  0x98   :  { %v875_v55 = vpop.xlane.xlu1 %67  ;;  %v877_v56 = vpop.xlane.xlu0 %64 }
  0x99   :  { %v229_v23 = vsub.f32 %v753_v14, %v877_v56  ;;  %574 = vpow2.f32 %v247_v20  ;;  %v230_v39 = vsub.f32 %v748_v13, %v875_v55 }
  0x9a   :  { %576 = vpow2.f32 %v245_v28 }
  0x9b   :  { %v251_v33 = vmul.f32 1.442695, %v229_v23  ;;  %v253_v47 = vmul.f32 1.442695, %v230_v39 }
  0x9c   :  { %v879_v57 = vpop.xlane.xlu1 %73  ;;  %v881_v58 = vpop.xlane.xlu0 %70 }
  0x9d   :  { %v231_v34 = vsub.f32 %v767_v18, %v881_v58  ;;  %578 = vpow2.f32 %v251_v33 }
  0x9e   :  { %580 = vpow2.f32 %v249_v38 }
  0x9f   :  { %v255_v42 = vmul.f32 1.442695, %v231_v34 }
  0xa0   :  { %v885_v60 = vpop.xlane.xlu1 %79  ;;  %v887_v61 = vpop.xlane.xlu0 %76 }
  0xa1   :  { %582 = vpow2.f32 %v255_v42  ;;  %v234_v15 = vsub.f32 %v776_v21, %v885_v60 }
  0xa2   :  { %v569_v45 = vpop.eup %568  ;;  %584 = vpow2.f32 %v253_v47 }
  0xa3   :  { %v274_v63 = vsel %vm44_vm0, %v569_v45, 0.0  ;;  %v261_v31 = vmul.f32 1.442695, %v234_v15 }
  0xa4   :  { %v891_v3 = vpop.xlane.xlu1 %85  ;;  %v895_v8 = vpop.xlane.xlu0 %82 }
  0xa8   :  { %v899_v12 = vpop.xlane.xlu1 %91  ;;  %v908_v24 = vpop.xlane.xlu0 %88 }
  0xa9   :  { %v238_v47 = vsub.f32 %v804_v29, %v899_v12 }
  0xac   :  { %v100_v27 = vpop.permute.xlu1 %99 }
  0xad   :  { %vm144_vm1 = vcmp.eq.s32.totalorder %v904_v16, %v100_v27 }
  0xae   :  { %v160_v32 = vsel %vm144_vm1, %v725_v5, 0.0  ;;  %v232_v5 = vsub.f32 %v762_v17, %v879_v57 }
  0xaf   :  { %v178_v35 = vsel %vm44_vm0, %v160_v32, 0.0 }
  0xb0   :  { %v103_v36 = vpop.permute.xlu1 %102  ;;  %179 = vadd.xlane.f32.xlu1 %v178_v35  ;;  %v97_v37 = vpop.permute.xlu0 %96  ;;  %v257_v48 = vmul.f32 1.442695, %v232_v5  ;;  %v236_v35 = vsub.f32 %v790_v25, %v891_v3 }
  0xb1   :  { %vm145_vm2 = vcmp.eq.s32.totalorder %v904_v16, %v103_v36  ;;  %vm143_vm3 = vcmp.eq.s32.totalorder %v904_v16, %v97_v37 }
  0xb2   :  { %v161_v40 = vsel %vm145_vm2, %v706_v0, 0.0  ;;  %v159_v41 = vsel %vm143_vm3, %v711_v1, 0.0  ;;  %v571_v0 = vpop.eup %570  ;;  %v233_v1 = vsub.f32 %v781_v22, %v887_v61  ;;  %586 = vpow2.f32 %v257_v48 }
  0xb3   :  { %v181_v43 = vsel %vm44_vm0, %v161_v40, 0.0  ;;  %v175_v44 = vsel %vm44_vm0, %v159_v41, 0.0  ;;  %v277_v11 = vsel %vm44_vm0, %v571_v0, 0.0  ;;  %v265_v40 = vmul.f32 1.442695, %v236_v35 }
  0xb4   :  { %v106_v46 = vpop.permute.xlu1 %105  ;;  %182 = vadd.xlane.f32.xlu1 %v181_v43  ;;  %176 = vadd.xlane.f32.xlu0 %v175_v44  ;;  %v259_v19 = vmul.f32 1.442695, %v233_v1  ;;  %v237_v43 = vsub.f32 %v809_v30, %v908_v24  ;;  %v124_v15 = vpop.permute.xlu0 %123 }
  0xb5   :  { %vm146_vm4 = vcmp.eq.s32.totalorder %v904_v16, %v106_v46  ;;  %vm152_vm10 = vcmp.eq.s32.totalorder %v904_v16, %v124_v15 }
  0xb6   :  { %v162_v59 = vsel %vm146_vm4, %v716_v2, 0.0  ;;  %v573_v2 = vpop.eup %572  ;;  %588 = vpow2.f32 %v259_v19  ;;  %v267_v48 = vmul.f32 1.442695, %v237_v43 }
  0xb7   :  { %v184_v62 = vsel %vm44_vm0, %v162_v59, 0.0  ;;  %v575_v23 = vpop.eup %574  ;;  %v271_v28 = vsel %vm44_vm0, %v573_v2, 0.0  ;;  %590 = vpow2.f32 %v261_v31 }
  0xb8   :  { %v109_v6 = vpop.permute.xlu1 %108  ;;  %185 = vadd.xlane.f32.xlu1 %v184_v62  ;;  %275 = vadd.xlane.f32.xlu0 %v274_v63  ;;  %v577_v27 = vpop.eup %576  ;;  %v283_v32 = vsel %vm44_vm0, %v575_v23, 0.0 }
  0xb9   :  { %vm147_vm5 = vcmp.eq.s32.totalorder %v904_v16, %v109_v6  ;;  %v579_v33 = vpop.eup %578  ;;  %v280_v38 = vsel %vm44_vm0, %v577_v27, 0.0  ;;  %v269_v6 = vmul.f32 1.442695, %v238_v47  ;;  %v130_v31 = vpop.permute.xlu0 %129 }
  0xba   :  { %v163_v7 = vsel %vm147_vm5, %v739_v10, 0.0  ;;  %v235_v10 = vsub.f32 %v795_v26, %v895_v8  ;;  %v581_v36 = vpop.eup %580  ;;  %v289_v39 = vsel %vm44_vm0, %v579_v33, 0.0  ;;  %vm154_vm11 = vcmp.eq.s32.totalorder %v904_v16, %v130_v31 }
  0xbb   :  { %v187_v20 = vsel %vm44_vm0, %v163_v7, 0.0  ;;  %v583_v5 = vpop.eup %582  ;;  %v286_v44 = vsel %vm44_vm0, %v581_v36, 0.0 }
  0xbc   :  { %188 = vadd.xlane.f32.xlu1 %v187_v20  ;;  %278 = vadd.xlane.f32.xlu0 %v277_v11  ;;  %v112_v34 = vpop.permute.xlu1 %111  ;;  %v263_v37 = vmul.f32 1.442695, %v235_v10  ;;  %v585_v42 = vpop.eup %584  ;;  %v295_v45 = vsel %vm44_vm0, %v583_v5, 0.0 }
  0xbd   :  { %vm148_vm6 = vcmp.eq.s32.totalorder %v904_v16, %v112_v34  ;;  %v292_v59 = vsel %vm44_vm0, %v585_v42, 0.0 }
  0xbe   :  { %592 = vpow2.f32 %v263_v37  ;;  %v164_v63 = vsel %vm148_vm6, %v734_v9, 0.0  ;;  %v136_v37 = vpop.permute.xlu0 %135 }
  0xbf   :  { %v587_v46 = vpop.eup %586  ;;  %594 = vpow2.f32 %v265_v40  ;;  %v190_v7 = vsel %vm44_vm0, %v164_v63, 0.0  ;;  %vm156_vm12 = vcmp.eq.s32.totalorder %v904_v16, %v136_v37 }
  0xc0   :  { %272 = vadd.xlane.f32.xlu1 %v271_v28  ;;  %284 = vadd.xlane.f32.xlu0 %v283_v32  ;;  %v115_v41 = vpop.permute.xlu1 %114  ;;  %v298_v0 = vsel %vm44_vm0, %v587_v46, 0.0  ;;  %596 = vpow2.f32 %v267_v48 }
  0xc1   :  { %vm149_vm7 = vcmp.eq.s32.totalorder %v904_v16, %v115_v41  ;;  %598 = vpow2.f32 %v269_v6  ;;  %v170_v41 = vsel %vm154_vm11, %v776_v21, 0.0 }
  0xc2   :  { %v165_v19 = vsel %vm149_vm7, %v753_v14, 0.0  ;;  %v142_v42 = vpop.permute.xlu0 %141 }
  0xc3   :  { %v589_v1 = vpop.eup %588  ;;  %v193_v9 = vsel %vm44_vm0, %v165_v19, 0.0  ;;  %vm158_vm14 = vcmp.eq.s32.totalorder %v904_v16, %v142_v42 }
  0xc4   :  { %281 = vadd.xlane.f32.xlu1 %v280_v38  ;;  %290 = vadd.xlane.f32.xlu0 %v289_v39  ;;  %v118_v62 = vpop.permute.xlu1 %117  ;;  %v301_v11 = vsel %vm44_vm0, %v589_v1, 0.0  ;;  %v591_v2 = vpop.eup %590  ;;  %v168_v38 = vsel %vm152_vm10, %v762_v17, 0.0  ;;  %v208_v17 = vsel %vm44_vm0, %v170_v41, 0.0 }
  0xc5   :  { %vm150_vm8 = vcmp.eq.s32.totalorder %v904_v16, %v118_v62  ;;  %v304_v23 = vsel %vm44_vm0, %v591_v2, 0.0  ;;  %v202_v5 = vsel %vm44_vm0, %v168_v38, 0.0 }
  0xc6   :  { %v166_v28 = vsel %vm150_vm8, %v748_v13, 0.0 }
  0xc7   :  { %v196_v32 = vsel %vm44_vm0, %v166_v28, 0.0 }
  0xc8   :  { %287 = vadd.xlane.f32.xlu1 %v286_v44  ;;  %296 = vadd.xlane.f32.xlu0 %v295_v45  ;;  %v121_v20 = vpop.permute.xlu1 %120  ;;  %v172_v45 = vsel %vm156_vm12, %v790_v25, 0.0 }
  0xc9   :  { %vm151_vm9 = vcmp.eq.s32.totalorder %v904_v16, %v121_v20  ;;  %v214_v47 = vsel %vm44_vm0, %v172_v45, 0.0 }
  0xca   :  { %v167_v33 = vsel %vm151_vm9, %v767_v18, 0.0 }
  0xcb   :  { %v593_v27 = vpop.eup %592  ;;  %v199_v35 = vsel %vm44_vm0, %v167_v33, 0.0 }
  0xcc   :  { %293 = vadd.xlane.f32.xlu1 %v292_v59  ;;  %299 = vadd.xlane.f32.xlu0 %v298_v0  ;;  %v595_v10 = vpop.eup %594  ;;  %v307_v14 = vsel %vm44_vm0, %v593_v27, 0.0  ;;  %v127_v34 = vpop.permute.xlu1 %126  ;;  %v174_v59 = vsel %vm158_vm14, %v804_v29, 0.0 }
  0xcd   :  { %v310_v36 = vsel %vm44_vm0, %v595_v10, 0.0  ;;  %v597_v13 = vpop.eup %596  ;;  %vm153_vm13 = vcmp.eq.s32.totalorder %v904_v16, %v127_v34  ;;  %v220_v25 = vsel %vm44_vm0, %v174_v59, 0.0 }
  0xce   :  { %v313_v39 = vsel %vm44_vm0, %v597_v13, 0.0  ;;  %v599_v18 = vpop.eup %598  ;;  %v169_v44 = vsel %vm153_vm13, %v781_v22, 0.0 }
  0xcf   :  { %v316_v43 = vsel %vm44_vm0, %v599_v18, 0.0  ;;  %v205_v46 = vsel %vm44_vm0, %v169_v44, 0.0 }
  0xd0   :  { %191 = vadd.xlane.f32.xlu1 %v190_v7  ;;  %302 = vadd.xlane.f32.xlu0 %v301_v11  ;;  %v133_v40 = vpop.permute.xlu1 %132 }
  0xd1   :  { %vm155_vm15 = vcmp.eq.s32.totalorder %v904_v16, %v133_v40 }
  0xd2   :  { %v171_v48 = vsel %vm155_vm15, %v795_v26, 0.0 }
  0xd3   :  { %v211_v22 = vsel %vm44_vm0, %v171_v48, 0.0 }
  0xd4   :  { %194 = vadd.xlane.f32.xlu1 %v193_v9  ;;  %305 = vadd.xlane.f32.xlu0 %v304_v23  ;;  %v139_v21 = vpop.permute.xlu1 %138 }
  0xd5   :  { %vm157_vm1 = vcmp.eq.s32.totalorder %v904_v16, %v139_v21 }
  0xd6   :  { %v173_v0 = vsel %vm157_vm1, %v809_v30, 0.0 }
  0xd7   :  { %v217_v1 = vsel %vm44_vm0, %v173_v0, 0.0 }
  0xd8   :  { %197 = vadd.xlane.f32.xlu1 %v196_v32  ;;  %308 = vadd.xlane.f32.xlu0 %v307_v14 }
  0xdc   :  { %200 = vadd.xlane.f32.xlu1 %v199_v35  ;;  %311 = vadd.xlane.f32.xlu0 %v310_v36 }
  0xe0   :  { %314 = vadd.xlane.f32.xlu0 %v313_v39  ;;  %203 = vadd.xlane.f32.xlu1 %v202_v5 }
  0xe4   :  { %317 = vadd.xlane.f32.xlu0 %v316_v43  ;;  %209 = vadd.xlane.f32.xlu1 %v208_v17 }
  0xe8   :  { %206 = vadd.xlane.f32.xlu0 %v205_v46  ;;  %215 = vadd.xlane.f32.xlu1 %v214_v47 }
  0xec   :  { %212 = vadd.xlane.f32.xlu0 %v211_v22  ;;  %221 = vadd.xlane.f32.xlu1 %v220_v25 }
  0xf0   :  { %218 = vadd.xlane.f32.xlu0 %v217_v1 }
 0x139   :  { %v180_v62 = vpop.xlane.xlu1 %179 }
 0x13a   :  { %v320_v9 = vsub.f32 %v180_v62, %v869_v52 }
 0x13d   :  { %v183_v63 = vpop.xlane.xlu1 %182  ;;  %v177_v6 = vpop.xlane.xlu0 %176 }
 0x13e   :  { %v321_v32 = vsub.f32 %v183_v63, %v863_v49  ;;  %v319_v38 = vsub.f32 %v177_v6, %v865_v50 }
 0x141   :  { %v186_v7 = vpop.xlane.xlu1 %185  ;;  %v276_v26 = vpop.xlane.xlu0 %275 }
 0x142   :  { %600 = vlog2.f32 %v276_v26  ;;  %v322_v21 = vsub.f32 %v186_v7, %v867_v51 }
 0x145   :  { %v189_v29 = vpop.xlane.xlu1 %188  ;;  %v279_v11 = vpop.xlane.xlu0 %278 }
 0x146   :  { %602 = vlog2.f32 %v279_v11  ;;  %v323_v18 = vsub.f32 %v189_v29, %v873_v54 }
 0x149   :  { %v273_v2 = vpop.xlane.xlu1 %272  ;;  %v285_v15 = vpop.xlane.xlu0 %284 }
 0x14a   :  { %604 = vlog2.f32 %v273_v2 }
 0x14b   :  { %606 = vlog2.f32 %v285_v15 }
 0x14d   :  { %v282_v19 = vpop.xlane.xlu1 %281  ;;  %v291_v20 = vpop.xlane.xlu0 %290 }
 0x14e   :  { %608 = vlog2.f32 %v282_v19 }
 0x14f   :  { %v601_v30 = vpop.eup %600  ;;  %610 = vlog2.f32 %v291_v20 }
 0x150   :  { %v338_v23 = vmul.f32 0.6931472, %v601_v30 }
 0x151   :  { %v288_v27 = vpop.xlane.xlu1 %287  ;;  %v297_v28 = vpop.xlane.xlu0 %296 }
 0x152   :  { %v995_v31 = vsub.f32 %v320_v9, %v338_v23  ;;  %612 = vlog2.f32 %v288_v27 }
 0x153   :  { %v603_v10 = vpop.eup %602 }
 0x154   :  { %v400_v14 = vmul.f32 0.7, %v995_v31  ;;  %v340_v33 = vmul.f32 0.6931472, %v603_v10 }
 0x155   :  { %v294_v34 = vpop.xlane.xlu1 %293  ;;  %v300_v35 = vpop.xlane.xlu0 %299 }
 0x156   :  { %v417_v36 = vmul.f32 1.442695, %v400_v14  ;;  %v999_v13 = vsub.f32 %v321_v32, %v340_v33  ;;  %614 = vlog2.f32 %v294_v34 }
 0x157   :  { %v605_v37 = vpop.eup %604  ;;  %616 = vlog2.f32 %v297_v28 }
 0x158   :  { %v607_v52 = vpop.eup %606  ;;  %v401_v39 = vmul.f32 0.7, %v999_v13  ;;  %v336_v5 = vmul.f32 0.6931472, %v605_v37  ;;  %618 = vlog2.f32 %v300_v35 }
 0x159   :  { %v344_v49 = vmul.f32 0.6931472, %v607_v52  ;;  %v192_v40 = vpop.xlane.xlu1 %191  ;;  %v303_v41 = vpop.xlane.xlu0 %302  ;;  %620 = vpow2.f32 %v417_v36 }
 0x15a   :  { %v419_v42 = vmul.f32 1.442695, %v401_v39  ;;  %v1004_v43 = vsub.f32 %v319_v38, %v336_v5  ;;  %v324_v6 = vsub.f32 %v192_v40, %v871_v53 }
 0x15b   :  { %v609_v17 = vpop.eup %608  ;;  %v1006_v44 = vsub.f32 %v323_v18, %v344_v49 }
 0x15c   :  { %v611_v45 = vpop.eup %610  ;;  %622 = vpow2.f32 %v419_v42  ;;  %v399_v50 = vmul.f32 0.7, %v1004_v43  ;;  %v342_v46 = vmul.f32 0.6931472, %v609_v17  ;;  %v384_v42 = vsub.f32 0.0, %v995_v31 }
 0x15d   :  { %v403_v54 = vmul.f32 0.7, %v1006_v44  ;;  %v195_v47 = vpop.xlane.xlu1 %194  ;;  %v306_v48 = vpop.xlane.xlu0 %305  ;;  %v348_v62 = vmul.f32 0.6931472, %v611_v45 }
 0x15e   :  { %v415_v59 = vmul.f32 1.442695, %v399_v50  ;;  %v1011_v22 = vsub.f32 %v322_v21, %v342_v46  ;;  %v325_v25 = vsub.f32 %v195_v47, %v877_v56  ;;  %624 = vlog2.f32 %v306_v48 }
 0x15f   :  { %v613_v0 = vpop.eup %612  ;;  %v423_v1 = vmul.f32 1.442695, %v403_v54  ;;  %v1021_v56 = vshrl.u32 %v93_v4, 7 }
 0x160   :  { %626 = vpow2.f32 %v415_v59  ;;  %v402_v51 = vmul.f32 0.7, %v1011_v22  ;;  %v346_v63 = vmul.f32 0.6931472, %v613_v0  ;;  %v1016_v7 = vsub.f32 %v325_v25, %v348_v62 }
 0x161   :  { %628 = vpow2.f32 %v423_v1  ;;  %v198_v26 = vpop.xlane.xlu1 %197  ;;  %v309_v29 = vpop.xlane.xlu0 %308  ;;  %v481_v34 = vadd.s32 8, %v1021_v56  ;;  %v482_v35 = vadd.s32 16, %v1021_v56  ;;  %vm496_vm3 = vcmp.eq.s32.totalorder %v1021_v56, %v904_v16 }
 0x162   :  { %v421_v11 = vmul.f32 1.442695, %v402_v51  ;;  %v1018_v2 = vsub.f32 %v324_v6, %v346_v63  ;;  %630 = vlog2.f32 %v303_v41  ;;  %v405_v19 = vmul.f32 0.7, %v1016_v7 }
 0x163   :  { %v615_v15 = vpop.eup %614  ;;  %v326_v9 = vsub.f32 %v198_v26, %v875_v55  ;;  %vm497_vm0 = vcmp.eq.s32.totalorder %v481_v34, %v904_v16  ;;  %vm498_vm2 = vcmp.eq.s32.totalorder %v482_v35, %v904_v16  ;;  %v483_v50 = vadd.s32 24, %v1021_v56 }
 0x164   :  { %v617_v20 = vpop.eup %616  ;;  %632 = vpow2.f32 %v421_v11  ;;  %v350_v30 = vmul.f32 0.6931472, %v615_v15  ;;  %v404_v53 = vmul.f32 0.7, %v1018_v2  ;;  %v427_v23 = vmul.f32 1.442695, %v405_v19 }
 0x165   :  { %v201_v27 = vpop.xlane.xlu1 %200  ;;  %v312_v28 = vpop.xlane.xlu0 %311  ;;  %634 = vlog2.f32 %v309_v29  ;;  %v352_v36 = vmul.f32 0.6931472, %v617_v20  ;;  %v383_v25 = vsub.f32 0.0, %v1004_v43  ;;  %v484_v1 = vadd.s32 32, %v1021_v56 }
 0x166   :  { %v619_v10 = vpop.eup %618  ;;  %v425_v32 = vmul.f32 1.442695, %v404_v53  ;;  %v1026_v14 = vsub.f32 %v326_v9, %v350_v30  ;;  %v327_v4 = vsub.f32 %v201_v27, %v881_v58  ;;  %636 = vpow2.f32 %v427_v23 }
 0x167   :  { %v621_v33 = vpop.eup %620  ;;  %v354_v18 = vmul.f32 0.6931472, %v619_v10  ;;  %vm499_vm4 = vcmp.eq.s32.totalorder %v483_v50, %v904_v16  ;;  %v386_v43 = vsub.f32 0.0, %v1011_v22  ;;  %v387_v23 = vsub.f32 0.0, %v1006_v44 }
 0x168   :  { %638 = vpow2.f32 %v425_v32  ;;  %v406_v55 = vmul.f32 0.7, %v1026_v14  ;;  %v1032_v52 = vsub.f32 %v327_v4, %v352_v36  ;;  %v448_v5 = vmul.f32 0.7, %v621_v33 }
 0x169   :  { %v623_v37 = vpop.eup %622  ;;  %640 = vlog2.f32 %v312_v28  ;;  %v204_v38 = vpop.xlane.xlu1 %203  ;;  %v485_v27 = vadd.s32 40, %v1021_v56  ;;  %vm500_vm5 = vcmp.eq.s32.totalorder %v484_v1, %v904_v16 }
 0x16a   :  { %v315_v39 = vpop.xlane.xlu0 %314  ;;  %v328_v58 = vsub.f32 %v204_v38, %v879_v57  ;;  %v429_v49 = vmul.f32 1.442695, %v406_v55  ;;  %v407_v40 = vmul.f32 0.7, %v1032_v52  ;;  %v449_v17 = vmul.f32 0.7, %v623_v37 }
 0x16b   :  { %642 = vlog2.f32 %v315_v39  ;;  %v625_v41 = vpop.eup %624  ;;  %v385_v57 = vsub.f32 0.0, %v999_v13  ;;  %v464_v59 = vmul.f32 %v448_v5, %v384_v42  ;;  %vm501_vm6 = vcmp.eq.s32.totalorder %v485_v27, %v904_v16 }
 0x16c   :  { %v1041_v45 = vsub.f32 %v328_v58, %v354_v18  ;;  %644 = vpow2.f32 %v429_v49  ;;  %v431_v46 = vmul.f32 1.442695, %v407_v40  ;;  %v358_v62 = vmul.f32 0.6931472, %v625_v41 }
 0x16d   :  { %v627_v21 = vpop.eup %626  ;;  %v210_v54 = vpop.xlane.xlu1 %209  ;;  %v465_v63 = vmul.f32 %v449_v17, %v385_v57  ;;  %v513_v20 = vsel %vm497_vm0, %v464_v59, 0.0  ;;  %v388_v18 = vsub.f32 0.0, %v1018_v2 }
 0x16e   :  { %v318_v47 = vpop.xlane.xlu0 %317  ;;  %v629_v48 = vpop.eup %628  ;;  %v447_v31 = vmul.f32 0.7, %v627_v21  ;;  %v408_v0 = vmul.f32 0.7, %v1041_v45  ;;  %646 = vpow2.f32 %v431_v46  ;;  %v330_v51 = vsub.f32 %v210_v54, %v885_v60 }
 0x16f   :  { %v631_v13 = vpop.eup %630  ;;  %648 = vlog2.f32 %v318_v47  ;;  %v451_v11 = vmul.f32 0.7, %v629_v48  ;;  %v514_v10 = vsel %vm498_vm2, %v465_v63, 0.0 }
 0x170   :  { %v463_v6 = vmul.f32 %v447_v31, %v383_v25  ;;  %v433_v26 = vmul.f32 1.442695, %v408_v0  ;;  %v1051_v15 = vsub.f32 %v330_v51, %v358_v62  ;;  %v356_v4 = vmul.f32 0.6931472, %v631_v13 }
 0x171   :  { %v633_v29 = vpop.eup %632  ;;  %v216_v33 = vpop.xlane.xlu1 %215  ;;  %v467_v37 = vmul.f32 %v451_v11, %v387_v23  ;;  %v389_v62 = vsub.f32 0.0, %v1016_v7  ;;  %v390_v11 = vsub.f32 0.0, %v1026_v14  ;;  %v488_v14 = vadd.s32 64, %v1021_v56 }
 0x172   :  { %v207_v19 = vpop.xlane.xlu0 %206  ;;  %v512_v60 = vsel %vm496_vm3, %v463_v6, 0.0  ;;  %v450_v30 = vmul.f32 0.7, %v633_v29  ;;  %650 = vpow2.f32 %v433_v26  ;;  %v635_v53 = vpop.eup %634  ;;  %v410_v22 = vmul.f32 0.7, %v1051_v15 }
 0x173   :  { %v528_v9 = vadd.f32 %v513_v20, %v512_v60  ;;  %v637_v28 = vpop.eup %636  ;;  %v329_v34 = vsub.f32 %v207_v19, %v887_v61  ;;  %v486_v61 = vadd.s32 48, %v1021_v56  ;;  %v332_v42 = vsub.f32 %v216_v33, %v891_v3 }
 0x174   :  { %v466_v32 = vmul.f32 %v450_v30, %v386_v43  ;;  %v437_v38 = vmul.f32 1.442695, %v410_v22  ;;  %v360_v21 = vmul.f32 0.6931472, %v635_v53  ;;  %v516_v50 = vsel %vm500_vm5, %v467_v37, 0.0 }
 0x175   :  { %v639_v36 = vpop.eup %638  ;;  %v529_v55 = vadd.f32 %v528_v9, %v514_v10  ;;  %v1068_v58 = vsub.f32 %v329_v34, %v356_v4  ;;  %v453_v48 = vmul.f32 0.7, %v637_v28  ;;  %v222_v1 = vpop.xlane.xlu1 %221  ;;  %v487_v29 = vadd.s32 56, %v1021_v56 }
 0x176   :  { %v213_v44 = vpop.xlane.xlu0 %212  ;;  %v641_v39 = vpop.eup %640  ;;  %v515_v5 = vsel %vm499_vm4, %v466_v32, 0.0  ;;  %v452_v35 = vmul.f32 0.7, %v639_v36  ;;  %652 = vpow2.f32 %v437_v38  ;;  %v334_v7 = vsub.f32 %v222_v1, %v899_v12 }
 0x177   :  { %v530_v40 = vadd.f32 %v529_v55, %v515_v5  ;;  %v362_v41 = vmul.f32 0.6931472, %v641_v39  ;;  %v409_v57 = vmul.f32 0.7, %v1068_v58  ;;  %v331_v46 = vsub.f32 %v213_v44, %v895_v8 }
 0x178   :  { %v643_v49 = vpop.eup %642  ;;  %v468_v17 = vmul.f32 %v452_v35, %v388_v18  ;;  %v469_v43 = vmul.f32 %v453_v48, %v389_v62  ;;  %vm502_vm7 = vcmp.eq.s32.totalorder %v486_v61, %v904_v16  ;;  %vm503_vm8 = vcmp.eq.s32.totalorder %v487_v29, %v904_v16 }
 0x179   :  { %v1076_v2 = vsub.f32 %v332_v42, %v362_v41  ;;  %v645_v47 = vpop.eup %644  ;;  %v364_v59 = vmul.f32 0.6931472, %v643_v49  ;;  %v435_v25 = vmul.f32 1.442695, %v409_v57  ;;  %v531_v0 = vadd.f32 %v530_v40, %v516_v50 }
 0x17a   :  { %v219_v54 = vpop.xlane.xlu0 %218  ;;  %v517_v31 = vsel %vm501_vm6, %v468_v17, 0.0  ;;  %v454_v63 = vmul.f32 0.7, %v645_v47  ;;  %v1082_v6 = vsub.f32 %v331_v46, %v360_v21  ;;  %v518_v12 = vsel %vm502_vm7, %v469_v43, 0.0 }
 0x17b   :  { %v333_v3 = vsub.f32 %v219_v54, %v908_v24  ;;  %v412_v51 = vmul.f32 0.7, %v1076_v2  ;;  %v647_v13 = vpop.eup %646  ;;  %654 = vpow2.f32 %v435_v25  ;;  %v532_v30 = vadd.f32 %v531_v0, %v517_v31 }
 0x17c   :  { %v649_v26 = vpop.eup %648  ;;  %v411_v20 = vmul.f32 0.7, %v1082_v6  ;;  %v470_v9 = vmul.f32 %v454_v63, %v390_v11  ;;  %v455_v23 = vmul.f32 0.7, %v647_v13  ;;  %v391_v10 = vsub.f32 0.0, %v1032_v52 }
 0x17d   :  { %v1084_v8 = vsub.f32 %v333_v3, %v364_v59  ;;  %v441_v24 = vmul.f32 1.442695, %v412_v51  ;;  %v366_v19 = vmul.f32 0.6931472, %v649_v26  ;;  %v533_v33 = vadd.f32 %v532_v30, %v518_v12 }
 0x17e   :  { %v439_v22 = vmul.f32 1.442695, %v411_v20  ;;  %v489_v34 = vadd.s32 72, %v1021_v56  ;;  %v392_v36 = vsub.f32 0.0, %v1041_v45  ;;  %v519_v37 = vsel %vm503_vm8, %v470_v9, 0.0 }
 0x17f   :  { %v651_v60 = vpop.eup %650  ;;  %656 = vpow2.f32 %v441_v24  ;;  %v413_v53 = vmul.f32 0.7, %v1084_v8  ;;  %v1092_v27 = vsub.f32 %v334_v7, %v366_v19  ;;  %v471_v55 = vmul.f32 %v455_v23, %v391_v10 }
 0x180   :  { %v456_v32 = vmul.f32 0.7, %v651_v60  ;;  %658 = vpow2.f32 %v439_v22  ;;  %vm504_vm9 = vcmp.eq.s32.totalorder %v488_v14, %v904_v16  ;;  %v534_v5 = vadd.f32 %v533_v33, %v519_v37 }
 0x181   :  { %v443_v28 = vmul.f32 1.442695, %v413_v53  ;;  %v414_v4 = vmul.f32 0.7, %v1092_v27  ;;  %vm505_vm10 = vcmp.eq.s32.totalorder %v489_v34, %v904_v16  ;;  %v490_v52 = vadd.s32 80, %v1021_v56 }
 0x182   :  { %v472_v39 = vmul.f32 %v456_v32, %v392_v36  ;;  %v520_v18 = vsel %vm504_vm9, %v471_v55, 0.0  ;;  %v491_v45 = vadd.s32 88, %v1021_v56  ;;  %v393_v61 = vsub.f32 0.0, %v1068_v58 }
 0x183   :  { %v445_v38 = vmul.f32 1.442695, %v414_v4  ;;  %660 = vpow2.f32 %v443_v28  ;;  %v653_v44 = vpop.eup %652  ;;  %v535_v42 = vadd.f32 %v534_v5, %v520_v18  ;;  %v394_v17 = vsub.f32 0.0, %v1051_v15 }
 0x184   :  { %v458_v49 = vmul.f32 0.7, %v653_v44  ;;  %v521_v40 = vsel %vm505_vm10, %v472_v39, 0.0  ;;  %vm506_vm11 = vcmp.eq.s32.totalorder %v490_v52, %v904_v16  ;;  %vm507_vm12 = vcmp.eq.s32.totalorder %v491_v45, %v904_v16 }
 0x185   :  { %662 = vpow2.f32 %v445_v38  ;;  %v536_v50 = vadd.f32 %v535_v42, %v521_v40  ;;  %v492_v47 = vadd.s32 96, %v1021_v56  ;;  %v493_v48 = vadd.s32 104, %v1021_v56 }
 0x186   :  { %v474_v46 = vmul.f32 %v458_v49, %v394_v17  ;;  %v495_v3 = vadd.s32 120, %v1021_v56  ;;  %v494_v15 = vadd.s32 112, %v1021_v56  ;;  %v396_v62 = vsub.f32 0.0, %v1076_v2 }
 0x187   :  { %v395_v51 = vsub.f32 0.0, %v1082_v6  ;;  %vm508_vm13 = vcmp.eq.s32.totalorder %v492_v47, %v904_v16  ;;  %v397_v63 = vsub.f32 0.0, %v1084_v8  ;;  %vm509_vm14 = vcmp.eq.s32.totalorder %v493_v48, %v904_v16 }
 0x188   :  { %v655_v35 = vpop.eup %654  ;;  %v523_v0 = vsel %vm507_vm12, %v474_v46, 0.0  ;;  %v398_v56 = vsub.f32 0.0, %v1092_v27  ;;  %vm510_vm15 = vcmp.eq.s32.totalorder %v494_v15, %v904_v16  ;;  %vm511_vm1 = vcmp.eq.s32.totalorder %v495_v3, %v904_v16 }
 0x189   :  { %v457_v41 = vmul.f32 0.7, %v655_v35 }
 0x18b   :  { %v473_v57 = vmul.f32 %v457_v41, %v393_v61 }
 0x18c   :  { %v657_v21 = vpop.eup %656 }
 0x18d   :  { %v522_v54 = vsel %vm506_vm11, %v473_v57, 0.0  ;;  %v460_v59 = vmul.f32 0.7, %v657_v21  ;;  %v659_v58 = vpop.eup %658 }
 0x18e   :  { %v537_v25 = vadd.f32 %v536_v50, %v522_v54  ;;  %v459_v1 = vmul.f32 0.7, %v659_v58 }
 0x18f   :  { %v476_v11 = vmul.f32 %v460_v59, %v396_v62 }
 0x190   :  { %v661_v31 = vpop.eup %660  ;;  %v538_v13 = vadd.f32 %v537_v25, %v523_v0  ;;  %v475_v24 = vmul.f32 %v459_v1, %v395_v51 }
 0x191   :  { %v461_v26 = vmul.f32 0.7, %v661_v31  ;;  %v525_v20 = vsel %vm509_vm14, %v476_v11, 0.0 }
 0x192   :  { %v663_v29 = vpop.eup %662  ;;  %v524_v19 = vsel %vm508_vm13, %v475_v24, 0.0 }
 0x193   :  { %v462_v43 = vmul.f32 0.7, %v663_v29  ;;  %v477_v2 = vmul.f32 %v461_v26, %v397_v63  ;;  %v539_v7 = vadd.f32 %v538_v13, %v524_v19 }
 0x195   :  { %v478_v6 = vmul.f32 %v462_v43, %v398_v56  ;;  %v526_v60 = vsel %vm510_vm15, %v477_v2, 0.0  ;;  %v540_v8 = vadd.f32 %v539_v7, %v525_v20 }
 0x197   :  { %v527_v30 = vsel %vm511_vm1, %v478_v6, 0.0  ;;  %v541_v53 = vadd.f32 %v540_v8, %v526_v60 }
 0x199   :  { %v542_v9 = vadd.f32 %v541_v53, %v527_v30 }
 0x19b   :  { %v543_v23 = vrot.slane %v542_v9, 4 }
 0x19d   :  { %v544_v22 = vadd.f32 %v543_v23, %v542_v9 }
 0x19f   :  { %v545_v14 = vrot.slane %v544_v22, 2 }
 0x1a1   :  { %v546_v28 = vadd.f32 %v545_v14, %v544_v22 }
 0x1a3   :  { %v547_v27 = vrot.slane %v546_v28, 1 }
 0x1a5   :  { %v548_v12 = vadd.f32 %v547_v27, %v546_v28 }
 0x1a7   :  { %549 = vst [vmem:[#allocation2] sm:$0x1] %v548_v12 }
 0x1a8   :  { %675 = shalt.err (!%p672_p4)
}
 0x1a9   :  { %559 = dma.vmem_to_hbm [thread:$0]  %s557_s16, 16, %s1125_s2, [#allocation3]  }
 0x1aa   :  { %684 = dma.done.wait [#allocation3], 16  }
 0x1ab   :  { %685 = vsyncadd [#allocation3], 4294967280 }
 0x1ac   :  { %563 = vsyncpa [#allocation3], 1 }

</bundles_post_ra>
